<compile_context>
chip_gen: v5e
topology: v5e:2x2
jax: 0.10.0
libtpu: 0.0.40
codegen_flags: <defaults>
</compile_context>

<pallas_src>
import functools

import jax
import jax.numpy as jnp
import numpy as np
from jax.experimental import pallas as pl
from jax.experimental.pallas import tpu as pltpu


# ----------------------------------------------------------------------------
# Kernel bodies
# ----------------------------------------------------------------------------
def _conv3x3_band(a_mm, s_ref, t_ref, b_ref):
    """'Same' 3x3 conv on lane-dense rows.

      a_mm : (M, W*Cin)  activations already in the matmul dtype (bf16)
      s_ref: (2, M, M)   0/1 row-shift matrices (up / down, image-boundary aware)
      t_ref: (3, W*Cin, W*Cout) banded (Toeplitz-in-W) weights, one per kh
      b_ref: (1, W*Cout) conv bias (f32)
    Returns the f32 conv+bias output (M, W*Cout).
    """
    dt = a_mm.dtype
    # Exact row shifts: a_up[i] = a[i-1], a_dn[i] = a[i+1] within each image,
    # zero rows at image boundaries (encoded in the 0/1 matrices).
    a_up = jnp.dot(s_ref[0], a_mm, preferred_element_type=jnp.float32).astype(dt)
    a_dn = jnp.dot(s_ref[1], a_mm, preferred_element_type=jnp.float32).astype(dt)

    acc = jnp.dot(a_up, t_ref[0], preferred_element_type=jnp.float32)
    acc = acc + jnp.dot(a_mm, t_ref[1], preferred_element_type=jnp.float32)
    acc = acc + jnp.dot(a_dn, t_ref[2], preferred_element_type=jnp.float32)
    return acc + b_ref[...]


def _write_stats(st_ref, y):
    # Per-lane (sum, sum-of-squares) over the rows of this tile, kept in f32
    # to avoid E[x^2]-mean^2 cancellation problems.
    st_ref[0:1, :] = jnp.sum(y, axis=0, keepdims=True)
    st_ref[1:2, :] = jnp.sum(y * y, axis=0, keepdims=True)


def _conv_stats_kernel(x_ref, s_ref, t_ref, b_ref, y_ref, st_ref):
    """conv1: 3x3 conv + bias, emit per-tile BN statistics."""
    a_mm = x_ref[...].astype(t_ref.dtype)
    y = _conv3x3_band(a_mm, s_ref, t_ref, b_ref)
    y_ref[...] = y.astype(y_ref.dtype)
    _write_stats(st_ref, y)


def _bn_act_conv_stats_kernel(x_ref, s_ref, t_ref, b_ref, sc_ref, sh_ref,
                              y_ref, st_ref, *, neg_slope):
    """BN1 (folded scale/shift) + LeakyReLU + conv2 + bias, emit BN2 stats."""
    z = x_ref[...].astype(jnp.float32) * sc_ref[...] + sh_ref[...]
    a = jnp.where(z >= 0, z, neg_slope * z)
    # TODO(synk): dropout with p > 0 would mask `a` here via pltpu.prng_seed /
    # pltpu.prng_random_bits; only p == 0 (identity) is implemented.
    y = _conv3x3_band(a.astype(t_ref.dtype), s_ref, t_ref, b_ref)
    y_ref[...] = y.astype(y_ref.dtype)
    _write_stats(st_ref, y)


# ----------------------------------------------------------------------------
# Host-side weight / shift-matrix repacks (one-time, numpy)
# ----------------------------------------------------------------------------
def _build_banded_weights(w_oihw, width):
    """Torch conv weight (Cout, Cin, 3, 3) -> (3, W*Cin, W*Cout) banded matrices
    T[kh] so that a 'same' 3x3 conv on lane-dense rows is
        y[h] = a[h-1] @ T[0] + a[h] @ T[1] + a[h+1] @ T[2]
    (the kw zero padding is absorbed by the band structure)."""
    wt = np.asarray(w_oihw, np.float32)
    c_out, c_in = wt.shape[0], wt.shape[1]
    t = np.zeros((3, width * c_in, width * c_out), np.float32)
    for kh in range(3):
        for kw in range(3):
            blk = wt[:, :, kh, kw].T                     # (Cin, Cout)
            for wo in range(width):
                wi = wo + kw - 1
                if 0 <= wi < width:
                    t[kh, wi * c_in:(wi + 1) * c_in,
                      wo * c_out:(wo + 1) * c_out] = blk
    return jnp.asarray(t)


def _build_shift_mats(nb, img_h):
    """0/1 matrices S (2, M, M), M = nb*img_h:
         (S[0] @ a)[i] = a[i-1]  (zero on the first row of each image)
         (S[1] @ a)[i] = a[i+1]  (zero on the last  row of each image)"""
    m = nb * img_h
    s = np.zeros((2, m, m), np.float32)
    for i in range(m):
        if i % img_h != 0:
            s[0, i, i - 1] = 1.0
        if i % img_h != img_h - 1:
            s[1, i, i + 1] = 1.0
    return jnp.asarray(s)


def _pick_batch_tile(n, h, m_target=256):
    """Largest divisor nb of n with nb*h <= m_target (MXU-friendly M, keeps the
    f32 accumulator working set bounded)."""
    nb = 1
    for cand in range(1, n + 1):
        if n % cand == 0 and cand * h <= m_target:
            nb = cand
    return nb


def _vmem_limit(tile_bytes):
    # Double-buffered tiles + headroom; cap below v7x's 64 MiB physical VMEM.
    return int(min(48 << 20, max(16 << 20, 4 * tile_bytes)))


# ----------------------------------------------------------------------------
# Pallas passes
# ----------------------------------------------------------------------------
def _conv_pass(x_rows, shift, t, b_lane, sc_lane, sh_lane, *,
               mb, neg_slope, out_dtype):
    """One conv layer over lane-dense rows (rows = N*H, lanes = W*C).
    Returns (y, per-tile stats)."""
    rows, kin = x_rows.shape
    kdim, wcout = t.shape[1], t.shape[2]
    assert rows % mb == 0
    g = rows // mb
    pre_act = sc_lane is not None

    x_spec = pl.BlockSpec((mb, kin), lambda i: (i, 0))
    s_spec = pl.BlockSpec((2, mb, mb), lambda i: (0, 0, 0))
    t_spec = pl.BlockSpec((3, kdim, wcout), lambda i: (0, 0, 0))
    b_spec = pl.BlockSpec((1, wcout), lambda i: (0, 0))

    if pre_act:
        kern = functools.partial(_bn_act_conv_stats_kernel, neg_slope=neg_slope)
        aff_spec = pl.BlockSpec((1, kin), lambda i: (0, 0))
        in_specs = [x_spec, s_spec, t_spec, b_spec, aff_spec, aff_spec]
        args = (x_rows, shift, t, b_lane, sc_lane, sh_lane)
    else:
        kern = _conv_stats_kernel
        in_specs = [x_spec, s_spec, t_spec, b_spec]
        args = (x_rows, shift, t, b_lane)

    tile_bytes = (mb * kin * x_rows.dtype.itemsize
                  + 2 * mb * mb * shift.dtype.itemsize
                  + 3 * kdim * wcout * t.dtype.itemsize
                  + 4 * (wcout + 2 * kin)
                  + mb * wcout * jnp.dtype(out_dtype).itemsize
                  + 2 * wcout * 4)

    y, st = pl.pallas_call(
        kern,
        grid=(g,),
        in_specs=in_specs,
        out_specs=[
            pl.BlockSpec((mb, wcout), lambda i: (i, 0)),        # lane-dense y
            pl.BlockSpec((None, 2, wcout), lambda i: (i, 0, 0)),  # (sum, sumsq)
        ],
        out_shape=[
            jax.ShapeDtypeStruct((rows, wcout), out_dtype),
            jax.ShapeDtypeStruct((g, 2, wcout), jnp.float32),
        ],
        compiler_params=pltpu.CompilerParams(
            dimension_semantics=("parallel",),
            vmem_limit_bytes=_vmem_limit(tile_bytes)),
    )(*args)
    return y, st


def _fold_bn(stats, gamma, beta, count, width, c_out, eps):
    """Per-tile (sum, sumsq) -> per-channel BN (scale, shift), tiled to lanes."""
    s = stats.sum(axis=0).reshape(2, width, c_out).sum(axis=1)   # (2, Cout)
    mean = s[0] / count
    var = s[1] / count - mean * mean                             # biased (train)
    scale = gamma.astype(jnp.float32) * jax.lax.rsqrt(var + eps)
    shift = beta.astype(jnp.float32) - mean * scale
    return (jnp.tile(scale, width).reshape(1, -1),
            jnp.tile(shift, width).reshape(1, -1))


@functools.partial(jax.jit,
                   static_argnames=("nb", "eps", "neg_slope", "interm_dtype"))
def _conv_block_core(x_nchw, t1, t2, shift, b1, g1, be1, b2, g2, be2,
                     nb, eps, neg_slope, interm_dtype):
    n, c_in, h, w = x_nchw.shape
    c_out = t1.shape[2] // w
    wcin = w * c_in
    count = n * h * w
    mb = nb * h

    # NCHW -> lane-dense rows (N*H, W*Cin), cast to the MXU operand dtype.
    x_rows = (jnp.transpose(x_nchw, (0, 2, 3, 1))
              .reshape(n * h, wcin).astype(t1.dtype))

    def lane(v):
        return jnp.tile(v.astype(jnp.float32), w).reshape(1, -1)

    # Pass 1: conv1 + bias, emit BN1 statistics (f32).
    y1, st1 = _conv_pass(x_rows, shift, t1, lane(b1), None, None,
                         mb=mb, neg_slope=neg_slope, out_dtype=interm_dtype)
    sc1, sh1 = _fold_bn(st1, g1, be1, count, w, c_out, eps)

    # Pass 2: BN1 + LeakyReLU (+ dropout=identity) + conv2 + bias, BN2 stats.
    y2, st2 = _conv_pass(y1, shift, t2, lane(b2), sc1, sh1,
                         mb=mb, neg_slope=neg_slope, out_dtype=jnp.float32)
    sc2, sh2 = _fold_bn(st2, g2, be2, count, w, c_out, eps)

    # BN2 + LeakyReLU: one FMA + select, fused by XLA into the lane -> NCHW
    # epilogue (no third Pallas pass, no extra HBM round trip of y2).
    z = y2 * sc2 + sh2
    out_rows = jnp.where(z >= 0, z, neg_slope * z)
    return jnp.transpose(out_rows.reshape(n, h, w, c_out), (0, 3, 1, 2))


def conv_block_forward(x_nchw, params, dropout_p=0.0, eps=1e-5, neg_slope=0.01,
                       matmul_dtype=jnp.bfloat16):
    """x_nchw: (N, Cin, H, W) float32 (PyTorch layout)."""
    # TODO(synk): stochastic dropout (p > 0) is not implemented; p == 0 is exact.
    if float(dropout_p) != 0.0:
        raise NotImplementedError("only dropout_p == 0.0 is supported")

    n, _, h, w = x_nchw.shape
    nb = _pick_batch_tile(n, h)

    # One-time host-side repacks: banded (Toeplitz-in-W) weights and the
    # per-block 0/1 row-shift matrices (image-boundary aware).
    t1 = _build_banded_weights(params["w1"], w).astype(matmul_dtype)
    t2 = _build_banded_weights(params["w2"], w).astype(matmul_dtype)
    shift = _build_shift_mats(nb, h).astype(matmul_dtype)

    return _conv_block_core(
        x_nchw, t1, t2, shift,
        params["b1"], params["g1"], params["be1"],
        params["b2"], params["g2"], params["be2"],
        nb=nb, eps=float(eps), neg_slope=float(neg_slope),
        interm_dtype=matmul_dtype)


# ----------------------------------------------------------------------------
# Pure-JAX f32 reference (original module semantics, for verification)
# ----------------------------------------------------------------------------
def conv_block_reference(x_nchw, params, eps=1e-5, neg_slope=0.01):
    x = jnp.transpose(x_nchw, (0, 2, 3, 1)).astype(jnp.float32)

    def conv(xx, wgt, b):
        w_hwio = jnp.transpose(wgt, (2, 3, 1, 0))
        y = jax.lax.conv_general_dilated(
            xx, w_hwio, window_strides=(1, 1), padding="SAME",
            dimension_numbers=("NHWC", "HWIO", "NHWC"))
        return y + b.reshape(1, 1, 1, -1)

    def bn_lrelu(y, g, be):
        mean = jnp.mean(y, axis=(0, 1, 2), keepdims=True)
        var = jnp.mean((y - mean) ** 2, axis=(0, 1, 2), keepdims=True)
        z = (y - mean) * jax.lax.rsqrt(var + eps) * g.reshape(1, 1, 1, -1) \
            + be.reshape(1, 1, 1, -1)
        return jnp.where(z >= 0, z, neg_slope * z)

    y = bn_lrelu(conv(x, params["w1"], params["b1"]), params["g1"], params["be1"])
    y = bn_lrelu(conv(y, params["w2"], params["b2"]), params["g2"], params["be2"])
    return jnp.transpose(y, (0, 3, 1, 2))


if __name__ == "__main__":
    N, Cin, Cout, H, W = 2, 4, 8, 16, 16

    key = jax.random.PRNGKey(0)
    k = jax.random.split(key, 9)
    x = jax.random.normal(k[0], (N, Cin, H, W), jnp.float32)

    params = {
        "w1": 0.2 * jax.random.normal(k[1], (Cout, Cin, 3, 3), jnp.float32),
        "b1": 0.1 * jax.random.normal(k[2], (Cout,), jnp.float32),
        "g1": 1.0 + 0.1 * jax.random.normal(k[3], (Cout,), jnp.float32),
        "be1": 0.1 * jax.random.normal(k[4], (Cout,), jnp.float32),
        "w2": 0.2 * jax.random.normal(k[5], (Cout, Cout, 3, 3), jnp.float32),
        "b2": 0.1 * jax.random.normal(k[6], (Cout,), jnp.float32),
        "g2": 1.0 + 0.1 * jax.random.normal(k[7], (Cout,), jnp.float32),
        "be2": 0.1 * jax.random.normal(k[8], (Cout,), jnp.float32),
    }

    out = jax.block_until_ready(conv_block_forward(x, params, dropout_p=0.0))
    ref = jax.block_until_ready(conv_block_reference(x, params))

    # bf16 MXU operands bound the error (~1e-2 worst case); accumulation,
    # BN statistics and all elementwise math are f32.
    np.testing.assert_allclose(np.asarray(out), np.asarray(ref),
                               rtol=2e-2, atol=2e-2)
    print("KERNEL_OK")
</pallas_src>

<mosaic_0001>
module attributes {stable_mosaic.version = 11 : i64} {
  func.func @_conv_stats_kernel(%arg0: i32, %arg1: memref<32x64xbf16, #tpu.memory_space<vmem>>, %arg2: memref<2x32x32xbf16, #tpu.memory_space<vmem>>, %arg3: memref<3x64x128xbf16, #tpu.memory_space<vmem>>, %arg4: memref<1x128xf32, #tpu.memory_space<vmem>>, %arg5: memref<32x128xbf16, #tpu.memory_space<vmem>>, %arg6: memref<1x2x128xf32, #tpu.memory_space<vmem>>) attributes {dimension_semantics = [#tpu.dimension_semantics<parallel>], iteration_bounds = array<i64: 1>, scalar_prefetch = 0 : i64, scratch_operands = 0 : i64, tpu.core_type = #tpu.core_type<tc>, window_params = [{transform_indices = @transform_0, window_bounds = array<i64: 32, 64>}, {pipeline_mode = #tpu.pipeline_mode<synchronous>, transform_indices = @transform_1, window_bounds = array<i64: 2, 32, 32>}, {pipeline_mode = #tpu.pipeline_mode<synchronous>, transform_indices = @transform_2, window_bounds = array<i64: 3, 64, 128>}, {pipeline_mode = #tpu.pipeline_mode<synchronous>, transform_indices = @transform_3, window_bounds = array<i64: 1, 128>}, {transform_indices = @transform_4, window_bounds = array<i64: 32, 128>}, {transform_indices = @transform_5, window_bounds = array<i64: 1, 2, 128>}]} {
    %c0 = arith.constant 0 : index
    %c0_0 = arith.constant 0 : index
    %0 = vector.load %arg1[%c0, %c0_0] : memref<32x64xbf16, #tpu.memory_space<vmem>>, vector<32x64xbf16>
    %c0_1 = arith.constant 0 : index
    %c0_2 = arith.constant 0 : index
    %c0_3 = arith.constant 0 : index
    %1 = vector.load %arg2[%c0_1, %c0_2, %c0_3] : memref<2x32x32xbf16, #tpu.memory_space<vmem>>, vector<1x32x32xbf16>
    %2 = vector.shape_cast %1 : vector<1x32x32xbf16> to vector<32x32xbf16>
    %cst = arith.constant dense<0.000000e+00> : vector<32x64xf32>
    %3 = tpu.matmul %2, %0, %cst {dimension_numbers = #tpu.dot_dimension_numbers<[1], [0], [0], [1], [0, 0, 1, 1], [], []>} : vector<32x32xbf16>, vector<32x64xbf16>, vector<32x64xf32> -> vector<32x64xf32>
    %4 = arith.truncf %3 : vector<32x64xf32> to vector<32x64xbf16>
    %c1 = arith.constant 1 : index
    %c0_4 = arith.constant 0 : index
    %c0_5 = arith.constant 0 : index
    %5 = vector.load %arg2[%c1, %c0_4, %c0_5] : memref<2x32x32xbf16, #tpu.memory_space<vmem>>, vector<1x32x32xbf16>
    %6 = vector.shape_cast %5 : vector<1x32x32xbf16> to vector<32x32xbf16>
    %cst_6 = arith.constant dense<0.000000e+00> : vector<32x64xf32>
    %7 = tpu.matmul %6, %0, %cst_6 {dimension_numbers = #tpu.dot_dimension_numbers<[1], [0], [0], [1], [0, 0, 1, 1], [], []>} : vector<32x32xbf16>, vector<32x64xbf16>, vector<32x64xf32> -> vector<32x64xf32>
    %8 = arith.truncf %7 : vector<32x64xf32> to vector<32x64xbf16>
    %c0_7 = arith.constant 0 : index
    %c0_8 = arith.constant 0 : index
    %c0_9 = arith.constant 0 : index
    %9 = vector.load %arg3[%c0_7, %c0_8, %c0_9] : memref<3x64x128xbf16, #tpu.memory_space<vmem>>, vector<1x64x128xbf16>
    %10 = vector.shape_cast %9 : vector<1x64x128xbf16> to vector<64x128xbf16>
    %cst_10 = arith.constant dense<0.000000e+00> : vector<32x128xf32>
    %11 = tpu.matmul %4, %10, %cst_10 {dimension_numbers = #tpu.dot_dimension_numbers<[1], [0], [0], [1], [0, 0, 1, 1], [], []>} : vector<32x64xbf16>, vector<64x128xbf16>, vector<32x128xf32> -> vector<32x128xf32>
    %c1_11 = arith.constant 1 : index
    %c0_12 = arith.constant 0 : index
    %c0_13 = arith.constant 0 : index
    %12 = vector.load %arg3[%c1_11, %c0_12, %c0_13] : memref<3x64x128xbf16, #tpu.memory_space<vmem>>, vector<1x64x128xbf16>
    %13 = vector.shape_cast %12 : vector<1x64x128xbf16> to vector<64x128xbf16>
    %cst_14 = arith.constant dense<0.000000e+00> : vector<32x128xf32>
    %14 = tpu.matmul %0, %13, %cst_14 {dimension_numbers = #tpu.dot_dimension_numbers<[1], [0], [0], [1], [0, 0, 1, 1], [], []>} : vector<32x64xbf16>, vector<64x128xbf16>, vector<32x128xf32> -> vector<32x128xf32>
    %15 = arith.addf %11, %14 : vector<32x128xf32>
    %c2 = arith.constant 2 : index
    %c0_15 = arith.constant 0 : index
    %c0_16 = arith.constant 0 : index
    %16 = vector.load %arg3[%c2, %c0_15, %c0_16] : memref<3x64x128xbf16, #tpu.memory_space<vmem>>, vector<1x64x128xbf16>
    %17 = vector.shape_cast %16 : vector<1x64x128xbf16> to vector<64x128xbf16>
    %cst_17 = arith.constant dense<0.000000e+00> : vector<32x128xf32>
    %18 = tpu.matmul %8, %17, %cst_17 {dimension_numbers = #tpu.dot_dimension_numbers<[1], [0], [0], [1], [0, 0, 1, 1], [], []>} : vector<32x64xbf16>, vector<64x128xbf16>, vector<32x128xf32> -> vector<32x128xf32>
    %19 = arith.addf %15, %18 : vector<32x128xf32>
    %c0_18 = arith.constant 0 : index
    %c0_19 = arith.constant 0 : index
    %20 = vector.load %arg4[%c0_18, %c0_19] : memref<1x128xf32, #tpu.memory_space<vmem>>, vector<1x128xf32>
    %21 = vector.broadcast %20 : vector<1x128xf32> to vector<32x128xf32>
    %22 = arith.addf %19, %21 : vector<32x128xf32>
    %23 = arith.truncf %22 : vector<32x128xf32> to vector<32x128xbf16>
    %c0_20 = arith.constant 0 : index
    %c0_21 = arith.constant 0 : index
    %24 = vector.load %arg5[%c0_20, %c0_21] : memref<32x128xbf16, #tpu.memory_space<vmem>>, vector<32x128xbf16>
    tpu.vector_store %arg5[%c0_20, %c0_21], %23 {strides = array<i32>} : memref<32x128xbf16, #tpu.memory_space<vmem>>, vector<32x128xbf16>,
    %cst_22 = arith.constant dense<0.000000e+00> : vector<128xf32>
    %25 = vector.multi_reduction <add>, %22, %cst_22 [0] : vector<32x128xf32> to vector<128xf32>
    %26 = vector.shape_cast %25 : vector<128xf32> to vector<1x128xf32>
    %c0_23 = arith.constant 0 : index
    %c0_24 = arith.constant 0 : index
    %c0_25 = arith.constant 0 : index
    %27 = vector.load %arg6[%c0_23, %c0_24, %c0_25] : memref<1x2x128xf32, #tpu.memory_space<vmem>>, vector<1x1x128xf32>
    %28 = vector.shape_cast %27 : vector<1x1x128xf32> to vector<1x128xf32>
    %29 = vector.shape_cast %26 : vector<1x128xf32> to vector<1x1x128xf32>
    tpu.vector_store %arg6[%c0_23, %c0_24, %c0_25], %29 {strides = array<i32>} : memref<1x2x128xf32, #tpu.memory_space<vmem>>, vector<1x1x128xf32>,
    %30 = arith.mulf %22, %22 : vector<32x128xf32>
    %cst_26 = arith.constant dense<0.000000e+00> : vector<128xf32>
    %31 = vector.multi_reduction <add>, %30, %cst_26 [0] : vector<32x128xf32> to vector<128xf32>
    %32 = vector.shape_cast %31 : vector<128xf32> to vector<1x128xf32>
    %c0_27 = arith.constant 0 : index
    %c1_28 = arith.constant 1 : index
    %c0_29 = arith.constant 0 : index
    %33 = vector.load %arg6[%c0_27, %c1_28, %c0_29] : memref<1x2x128xf32, #tpu.memory_space<vmem>>, vector<1x1x128xf32>
    %34 = vector.shape_cast %33 : vector<1x1x128xf32> to vector<1x128xf32>
    %35 = vector.shape_cast %32 : vector<1x128xf32> to vector<1x1x128xf32>
    tpu.vector_store %arg6[%c0_27, %c1_28, %c0_29], %35 {strides = array<i32>} : memref<1x2x128xf32, #tpu.memory_space<vmem>>, vector<1x1x128xf32>,
    return
  }
  func.func @transform_0(%arg0: i32) -> (i32, i32) {
    %c0_i32 = arith.constant 0 : i32
    %c0_i32_0 = arith.constant 0 : i32
    return %arg0, %c0_i32 : i32, i32
  }
  func.func @transform_1(%arg0: i32) -> (i32, i32, i32) {
    %c0_i32 = arith.constant 0 : i32
    %c0_i32_0 = arith.constant 0 : i32
    %c0_i32_1 = arith.constant 0 : i32
    %c0_i32_2 = arith.constant 0 : i32
    return %c0_i32, %c0_i32_0, %c0_i32_1 : i32, i32, i32
  }
  func.func @transform_2(%arg0: i32) -> (i32, i32, i32) {
    %c0_i32 = arith.constant 0 : i32
    %c0_i32_0 = arith.constant 0 : i32
    %c0_i32_1 = arith.constant 0 : i32
    %c0_i32_2 = arith.constant 0 : i32
    return %c0_i32, %c0_i32_0, %c0_i32_1 : i32, i32, i32
  }
  func.func @transform_3(%arg0: i32) -> (i32, i32) {
    %c0_i32 = arith.constant 0 : i32
    %c0_i32_0 = arith.constant 0 : i32
    %c0_i32_1 = arith.constant 0 : i32
    return %c0_i32, %c0_i32_0 : i32, i32
  }
  func.func @transform_4(%arg0: i32) -> (i32, i32) {
    %c0_i32 = arith.constant 0 : i32
    %c0_i32_0 = arith.constant 0 : i32
    return %arg0, %c0_i32 : i32, i32
  }
  func.func @transform_5(%arg0: i32) -> (i32, i32, i32) {
    %c0_i32 = arith.constant 0 : i32
    %c0_i32_0 = arith.constant 0 : i32
    %c0_i32_1 = arith.constant 0 : i32
    return %arg0, %c0_i32, %c0_i32_0 : i32, i32, i32
  }
}

module attributes {stable_mosaic.version = 11 : i64} {
  func.func @_bn_act_conv_stats_kernel(%arg0: i32, %arg1: memref<32x128xbf16, #tpu.memory_space<vmem>>, %arg2: memref<2x32x32xbf16, #tpu.memory_space<vmem>>, %arg3: memref<3x128x128xbf16, #tpu.memory_space<vmem>>, %arg4: memref<1x128xf32, #tpu.memory_space<vmem>>, %arg5: memref<1x128xf32, #tpu.memory_space<vmem>>, %arg6: memref<1x128xf32, #tpu.memory_space<vmem>>, %arg7: memref<32x128xf32, #tpu.memory_space<vmem>>, %arg8: memref<1x2x128xf32, #tpu.memory_space<vmem>>) attributes {dimension_semantics = [#tpu.dimension_semantics<parallel>], iteration_bounds = array<i64: 1>, scalar_prefetch = 0 : i64, scratch_operands = 0 : i64, tpu.core_type = #tpu.core_type<tc>, window_params = [{transform_indices = @transform_0, window_bounds = array<i64: 32, 128>}, {pipeline_mode = #tpu.pipeline_mode<synchronous>, transform_indices = @transform_1, window_bounds = array<i64: 2, 32, 32>}, {pipeline_mode = #tpu.pipeline_mode<synchronous>, transform_indices = @transform_2, window_bounds = array<i64: 3, 128, 128>}, {pipeline_mode = #tpu.pipeline_mode<synchronous>, transform_indices = @transform_3, window_bounds = array<i64: 1, 128>}, {pipeline_mode = #tpu.pipeline_mode<synchronous>, transform_indices = @transform_4, window_bounds = array<i64: 1, 128>}, {pipeline_mode = #tpu.pipeline_mode<synchronous>, transform_indices = @transform_5, window_bounds = array<i64: 1, 128>}, {transform_indices = @transform_6, window_bounds = array<i64: 32, 128>}, {transform_indices = @transform_7, window_bounds = array<i64: 1, 2, 128>}]} {
    %c0 = arith.constant 0 : index
    %c0_0 = arith.constant 0 : index
    %0 = vector.load %arg1[%c0, %c0_0] : memref<32x128xbf16, #tpu.memory_space<vmem>>, vector<32x128xbf16>
    %1 = arith.extf %0 : vector<32x128xbf16> to vector<32x128xf32>
    %c0_1 = arith.constant 0 : index
    %c0_2 = arith.constant 0 : index
    %2 = vector.load %arg5[%c0_1, %c0_2] : memref<1x128xf32, #tpu.memory_space<vmem>>, vector<1x128xf32>
    %3 = vector.broadcast %2 : vector<1x128xf32> to vector<32x128xf32>
    %4 = arith.mulf %1, %3 : vector<32x128xf32>
    %c0_3 = arith.constant 0 : index
    %c0_4 = arith.constant 0 : index
    %5 = vector.load %arg6[%c0_3, %c0_4] : memref<1x128xf32, #tpu.memory_space<vmem>>, vector<1x128xf32>
    %6 = vector.broadcast %5 : vector<1x128xf32> to vector<32x128xf32>
    %7 = arith.addf %4, %6 : vector<32x128xf32>
    %cst = arith.constant 0.000000e+00 : f32
    %8 = vector.broadcast %cst : f32 to vector<32x128xf32>
    %9 = arith.cmpf oge, %7, %8 : vector<32x128xf32>
    %cst_5 = arith.constant 0.00999999977 : f32
    %10 = vector.broadcast %cst_5 : f32 to vector<32x128xf32>
    %11 = arith.mulf %10, %7 : vector<32x128xf32>
    %12 = arith.select %9, %7, %11 : vector<32x128xi1>, vector<32x128xf32>
    %13 = arith.truncf %12 : vector<32x128xf32> to vector<32x128xbf16>
    %c0_6 = arith.constant 0 : index
    %c0_7 = arith.constant 0 : index
    %c0_8 = arith.constant 0 : index
    %14 = vector.load %arg2[%c0_6, %c0_7, %c0_8] : memref<2x32x32xbf16, #tpu.memory_space<vmem>>, vector<1x32x32xbf16>
    %15 = vector.shape_cast %14 : vector<1x32x32xbf16> to vector<32x32xbf16>
    %cst_9 = arith.constant dense<0.000000e+00> : vector<32x128xf32>
    %16 = tpu.matmul %15, %13, %cst_9 {dimension_numbers = #tpu.dot_dimension_numbers<[1], [0], [0], [1], [0, 0, 1, 1], [], []>} : vector<32x32xbf16>, vector<32x128xbf16>, vector<32x128xf32> -> vector<32x128xf32>
    %17 = arith.truncf %16 : vector<32x128xf32> to vector<32x128xbf16>
    %c1 = arith.constant 1 : index
    %c0_10 = arith.constant 0 : index
    %c0_11 = arith.constant 0 : index
    %18 = vector.load %arg2[%c1, %c0_10, %c0_11] : memref<2x32x32xbf16, #tpu.memory_space<vmem>>, vector<1x32x32xbf16>
    %19 = vector.shape_cast %18 : vector<1x32x32xbf16> to vector<32x32xbf16>
    %cst_12 = arith.constant dense<0.000000e+00> : vector<32x128xf32>
    %20 = tpu.matmul %19, %13, %cst_12 {dimension_numbers = #tpu.dot_dimension_numbers<[1], [0], [0], [1], [0, 0, 1, 1], [], []>} : vector<32x32xbf16>, vector<32x128xbf16>, vector<32x128xf32> -> vector<32x128xf32>
    %21 = arith.truncf %20 : vector<32x128xf32> to vector<32x128xbf16>
    %c0_13 = arith.constant 0 : index
    %c0_14 = arith.constant 0 : index
    %c0_15 = arith.constant 0 : index
    %22 = vector.load %arg3[%c0_13, %c0_14, %c0_15] : memref<3x128x128xbf16, #tpu.memory_space<vmem>>, vector<1x128x128xbf16>
    %23 = vector.shape_cast %22 : vector<1x128x128xbf16> to vector<128x128xbf16>
    %cst_16 = arith.constant dense<0.000000e+00> : vector<32x128xf32>
    %24 = tpu.matmul %17, %23, %cst_16 {dimension_numbers = #tpu.dot_dimension_numbers<[1], [0], [0], [1], [0, 0, 1, 1], [], []>} : vector<32x128xbf16>, vector<128x128xbf16>, vector<32x128xf32> -> vector<32x128xf32>
    %c1_17 = arith.constant 1 : index
    %c0_18 = arith.constant 0 : index
    %c0_19 = arith.constant 0 : index
    %25 = vector.load %arg3[%c1_17, %c0_18, %c0_19] : memref<3x128x128xbf16, #tpu.memory_space<vmem>>, vector<1x128x128xbf16>
    %26 = vector.shape_cast %25 : vector<1x128x128xbf16> to vector<128x128xbf16>
    %cst_20 = arith.constant dense<0.000000e+00> : vector<32x128xf32>
    %27 = tpu.matmul %13, %26, %cst_20 {dimension_numbers = #tpu.dot_dimension_numbers<[1], [0], [0], [1], [0, 0, 1, 1], [], []>} : vector<32x128xbf16>, vector<128x128xbf16>, vector<32x128xf32> -> vector<32x128xf32>
    %28 = arith.addf %24, %27 : vector<32x128xf32>
    %c2 = arith.constant 2 : index
    %c0_21 = arith.constant 0 : index
    %c0_22 = arith.constant 0 : index
    %29 = vector.load %arg3[%c2, %c0_21, %c0_22] : memref<3x128x128xbf16, #tpu.memory_space<vmem>>, vector<1x128x128xbf16>
    %30 = vector.shape_cast %29 : vector<1x128x128xbf16> to vector<128x128xbf16>
    %cst_23 = arith.constant dense<0.000000e+00> : vector<32x128xf32>
    %31 = tpu.matmul %21, %30, %cst_23 {dimension_numbers = #tpu.dot_dimension_numbers<[1], [0], [0], [1], [0, 0, 1, 1], [], []>} : vector<32x128xbf16>, vector<128x128xbf16>, vector<32x128xf32> -> vector<32x128xf32>
    %32 = arith.addf %28, %31 : vector<32x128xf32>
    %c0_24 = arith.constant 0 : index
    %c0_25 = arith.constant 0 : index
    %33 = vector.load %arg4[%c0_24, %c0_25] : memref<1x128xf32, #tpu.memory_space<vmem>>, vector<1x128xf32>
    %34 = vector.broadcast %33 : vector<1x128xf32> to vector<32x128xf32>
    %35 = arith.addf %32, %34 : vector<32x128xf32>
    %c0_26 = arith.constant 0 : index
    %c0_27 = arith.constant 0 : index
    %36 = vector.load %arg7[%c0_26, %c0_27] : memref<32x128xf32, #tpu.memory_space<vmem>>, vector<32x128xf32>
    tpu.vector_store %arg7[%c0_26, %c0_27], %35 {strides = array<i32>} : memref<32x128xf32, #tpu.memory_space<vmem>>, vector<32x128xf32>,
    %cst_28 = arith.constant dense<0.000000e+00> : vector<128xf32>
    %37 = vector.multi_reduction <add>, %35, %cst_28 [0] : vector<32x128xf32> to vector<128xf32>
    %38 = vector.shape_cast %37 : vector<128xf32> to vector<1x128xf32>
    %c0_29 = arith.constant 0 : index
    %c0_30 = arith.constant 0 : index
    %c0_31 = arith.constant 0 : index
    %39 = vector.load %arg8[%c0_29, %c0_30, %c0_31] : memref<1x2x128xf32, #tpu.memory_space<vmem>>, vector<1x1x128xf32>
    %40 = vector.shape_cast %39 : vector<1x1x128xf32> to vector<1x128xf32>
    %41 = vector.shape_cast %38 : vector<1x128xf32> to vector<1x1x128xf32>
    tpu.vector_store %arg8[%c0_29, %c0_30, %c0_31], %41 {strides = array<i32>} : memref<1x2x128xf32, #tpu.memory_space<vmem>>, vector<1x1x128xf32>,
    %42 = arith.mulf %35, %35 : vector<32x128xf32>
    %cst_32 = arith.constant dense<0.000000e+00> : vector<128xf32>
    %43 = vector.multi_reduction <add>, %42, %cst_32 [0] : vector<32x128xf32> to vector<128xf32>
    %44 = vector.shape_cast %43 : vector<128xf32> to vector<1x128xf32>
    %c0_33 = arith.constant 0 : index
    %c1_34 = arith.constant 1 : index
    %c0_35 = arith.constant 0 : index
    %45 = vector.load %arg8[%c0_33, %c1_34, %c0_35] : memref<1x2x128xf32, #tpu.memory_space<vmem>>, vector<1x1x128xf32>
    %46 = vector.shape_cast %45 : vector<1x1x128xf32> to vector<1x128xf32>
    %47 = vector.shape_cast %44 : vector<1x128xf32> to vector<1x1x128xf32>
    tpu.vector_store %arg8[%c0_33, %c1_34, %c0_35], %47 {strides = array<i32>} : memref<1x2x128xf32, #tpu.memory_space<vmem>>, vector<1x1x128xf32>,
    return
  }
  func.func @transform_0(%arg0: i32) -> (i32, i32) {
    %c0_i32 = arith.constant 0 : i32
    %c0_i32_0 = arith.constant 0 : i32
    return %arg0, %c0_i32 : i32, i32
  }
  func.func @transform_1(%arg0: i32) -> (i32, i32, i32) {
    %c0_i32 = arith.constant 0 : i32
    %c0_i32_0 = arith.constant 0 : i32
    %c0_i32_1 = arith.constant 0 : i32
    %c0_i32_2 = arith.constant 0 : i32
    return %c0_i32, %c0_i32_0, %c0_i32_1 : i32, i32, i32
  }
  func.func @transform_2(%arg0: i32) -> (i32, i32, i32) {
    %c0_i32 = arith.constant 0 : i32
    %c0_i32_0 = arith.constant 0 : i32
    %c0_i32_1 = arith.constant 0 : i32
    %c0_i32_2 = arith.constant 0 : i32
    return %c0_i32, %c0_i32_0, %c0_i32_1 : i32, i32, i32
  }
  func.func @transform_3(%arg0: i32) -> (i32, i32) {
    %c0_i32 = arith.constant 0 : i32
    %c0_i32_0 = arith.constant 0 : i32
    %c0_i32_1 = arith.constant 0 : i32
    return %c0_i32, %c0_i32_0 : i32, i32
  }
  func.func @transform_4(%arg0: i32) -> (i32, i32) {
    %c0_i32 = arith.constant 0 : i32
    %c0_i32_0 = arith.constant 0 : i32
    %c0_i32_1 = arith.constant 0 : i32
    return %c0_i32, %c0_i32_0 : i32, i32
  }
  func.func @transform_5(%arg0: i32) -> (i32, i32) {
    %c0_i32 = arith.constant 0 : i32
    %c0_i32_0 = arith.constant 0 : i32
    %c0_i32_1 = arith.constant 0 : i32
    return %c0_i32, %c0_i32_0 : i32, i32
  }
  func.func @transform_6(%arg0: i32) -> (i32, i32) {
    %c0_i32 = arith.constant 0 : i32
    %c0_i32_0 = arith.constant 0 : i32
    return %arg0, %c0_i32 : i32, i32
  }
  func.func @transform_7(%arg0: i32) -> (i32, i32, i32) {
    %c0_i32 = arith.constant 0 : i32
    %c0_i32_0 = arith.constant 0 : i32
    %c0_i32_1 = arith.constant 0 : i32
    return %arg0, %c0_i32, %c0_i32_0 : i32, i32, i32
  }
}

</mosaic_0001>

<bundles_post_ra>
// kernel: tile.33
= control target key start
LH: loop header
LB: loop body
LE: loop exit
PB: predicated region body
PF: predicated region fallthrough
CT: control target
= control target key end

     0   :  { %s28_s0 = inlined_call_operand.vmem [shape: f32[8], index: 0, kind: input, shape index: {}]   ;;  %s29_s1 = inlined_call_operand.vmem [shape: f32[16,8], index: 1, kind: output, shape index: {}]  }
   0x1   :  { %v4_v0 = vld [vmem:[%s28_s0] ss:$0 sm:$0xff] }
   0x2   :  { %5 = vst [vmem:[%s29_s1] sm:$0xff] %v4_v0 }
   0x3   :  { %8 = vst [vmem:[%s29_s1 + $0x8] sm:$0xff] %v4_v0 }

// kernel: tile.34
= control target key start
LH: loop header
LB: loop body
LE: loop exit
PB: predicated region body
PF: predicated region fallthrough
CT: control target
= control target key end

     0   :  { %s131_s10 = smov 120   ;;  %s132_s11 = smov 104   ;;  %vm3_vm0 = vcmask 64512   ;;  %vm9_vm1 = vcmask 1048512   ;;  %vm15_vm2 = vcmask 982912   ;;  %vm21_vm3 = vcmask 917312   ;;  %s207_s0 = inlined_call_operand.vmem [shape: f32[16,8], index: 0, kind: input, shape index: {}]   ;;  %s208_s1 = inlined_call_operand.vmem [shape: f32[1,128], index: 1, kind: output, shape index: {}]  }
   0x1   :  { %v101_v0 = vld [vmem:[%s207_s0 + $0xf] sm:$0x1]   ;;  %v103_v1 = vld [vmem:[%s207_s0 + $0xd] sm:$0x1]   ;;  %v105_v2 = vld [vmem:[%s207_s0 + $0xb] sm:$0x1]  }
   0x2   :  { %7 = vrot.lane.b32.xlu0 %v101_v0, %s131_s10  ;;  %19 = vrot.lane.b32.xlu1 %v103_v1, %s132_s11  ;;  %s133_s14 = smov 88   ;;  %v102_v3 = vld [vmem:[%s207_s0 + $0xe] sm:$0x1]   ;;  %v104_v4 = vld [vmem:[%s207_s0 + $0xc] sm:$0x1]   ;;  %s134_s19 = smov 112  }
   0x3   :  { %31 = vrot.lane.b32.xlu2 %v105_v2, %s133_s14  ;;  %s135_s20 = smov 96   ;;  %v106_v5 = vld [vmem:[%s207_s0 + $0xa] sm:$0x1]   ;;  %s136_s23 = smov 80   ;;  %v107_v6 = vld [vmem:[%s207_s0 + $0x9] sm:$0x1]  }
   0x4   :  { %v108_v7 = vld [vmem:[%s207_s0 + $0x8] sm:$0x1]   ;;  %s137_s28 = smov 72   ;;  %s138_s29 = smov 64   ;;  %v109_v8 = vld [vmem:[%s207_s0 + $0x7] sm:$0x1]  }
   0x5   :  { %s139_s3 = smov 56   ;;  %v110_v9 = vld [vmem:[%s207_s0 + $0x6] sm:$0x1]   ;;  %v111_v10 = vld [vmem:[%s207_s0 + $0x5] sm:$0x1]   ;;  %s140_s8 = smov 48  }
   0x6   :  { %s141_s9 = smov 40   ;;  %v112_v11 = vld [vmem:[%s207_s0 + $0x4] sm:$0x1]   ;;  %s142_s12 = smov 32   ;;  %v113_v12 = vld [vmem:[%s207_s0 + $0x3] sm:$0x1]  }
   0x7   :  { %v114_v13 = vld [vmem:[%s207_s0 + $0x2] sm:$0x1]   ;;  %s143_s17 = smov 24   ;;  %s144_s18 = smov 16   ;;  %v115_v14 = vld [vmem:[%s207_s0 + $0x1] sm:$0x1]  }
   0x8   :  { %s145_s21 = smov 8   ;;  %v2_v15 = vld [vmem:[%s207_s0] sm:$0x1]   ;;  %vm27_vm4 = vcmask 851712   ;;  %vm33_vm5 = vcmask 786112   ;;  %vm39_vm6 = vcmask 720512  }
   0x9   :  { %4 = vst.msk [vmem:[#allocation0] sm:$0x1] %vm3_vm0, %v2_v15   ;;  %vm45_vm7 = vcmask 654912   ;;  %vm51_vm8 = vcmask 589312   ;;  %vm57_vm9 = vcmask 523712   ;;  %vm63_vm10 = vcmask 458112  }
   0xa   :  { %13 = vrot.lane.b32.xlu0 %v102_v3, %s134_s19  ;;  %25 = vrot.lane.b32.xlu1 %v104_v4, %s135_s20  ;;  %vm69_vm11 = vcmask 392512   ;;  %vm75_vm12 = vcmask 326912   ;;  %vm81_vm13 = vcmask 261312   ;;  %vm87_vm14 = vcmask 195712  }
   0xb   :  { %37 = vrot.lane.b32.xlu2 %v106_v5, %s136_s23  ;;  %vm93_vm15 = vcmask 130112  }
  0x12   :  { %43 = vrot.lane.b32.xlu0 %v107_v6, %s137_s28  ;;  %49 = vrot.lane.b32.xlu1 %v108_v7, %s138_s29 }
  0x13   :  { %55 = vrot.lane.b32.xlu2 %v109_v8, %s139_s3 }
  0x1a   :  { %61 = vrot.lane.b32.xlu0 %v110_v9, %s140_s8  ;;  %67 = vrot.lane.b32.xlu1 %v111_v10, %s141_s9 }
  0x1b   :  { %73 = vrot.lane.b32.xlu2 %v112_v11, %s142_s12 }
  0x22   :  { %79 = vrot.lane.b32.xlu0 %v113_v12, %s143_s17  ;;  %85 = vrot.lane.b32.xlu1 %v114_v13, %s144_s18 }
  0x23   :  { %91 = vrot.lane.b32.xlu2 %v115_v14, %s145_s21 }
  0x5d   :  { %v32_v16 = vpop.permute.xlu2 %31  }
  0x65   :  { %v38_v17 = vpop.permute.xlu2 %37  }
  0x6d   :  { %v56_v18 = vpop.permute.xlu2 %55  }
  0x74   :  { %v8_v19 = vpop.permute.xlu0 %7   ;;  %v20_v20 = vpop.permute.xlu1 %19  }
  0x75   :  { %10 = vst.msk [vmem:[#allocation0] sm:$0x1] %vm9_vm1, %v8_v19   ;;  %v74_v21 = vpop.permute.xlu2 %73  }
  0x7c   :  { %v14_v22 = vpop.permute.xlu0 %13   ;;  %v26_v23 = vpop.permute.xlu1 %25  }
  0x7d   :  { %16 = vst.msk [vmem:[#allocation0] sm:$0x1] %vm15_vm2, %v14_v22   ;;  %v92_v24 = vpop.permute.xlu2 %91  }
  0x7e   :  { %22 = vst.msk [vmem:[#allocation0] sm:$0x1] %vm21_vm3, %v20_v20  }
  0x7f   :  { %28 = vst.msk [vmem:[#allocation0] sm:$0x1] %vm27_vm4, %v26_v23  }
  0x80   :  { %34 = vst.msk [vmem:[#allocation0] sm:$0x1] %vm33_vm5, %v32_v16  }
  0x81   :  { %40 = vst.msk [vmem:[#allocation0] sm:$0x1] %vm39_vm6, %v38_v17  }
  0x84   :  { %v44_v25 = vpop.permute.xlu0 %43   ;;  %v50_v26 = vpop.permute.xlu1 %49  }
  0x85   :  { %46 = vst.msk [vmem:[#allocation0] sm:$0x1] %vm45_vm7, %v44_v25  }
  0x86   :  { %52 = vst.msk [vmem:[#allocation0] sm:$0x1] %vm51_vm8, %v50_v26  }
  0x87   :  { %58 = vst.msk [vmem:[#allocation0] sm:$0x1] %vm57_vm9, %v56_v18  }
  0x8c   :  { %v62_v27 = vpop.permute.xlu0 %61   ;;  %v68_v28 = vpop.permute.xlu1 %67  }
  0x8d   :  { %64 = vst.msk [vmem:[#allocation0] sm:$0x1] %vm63_vm10, %v62_v27  }
  0x8e   :  { %70 = vst.msk [vmem:[#allocation0] sm:$0x1] %vm69_vm11, %v68_v28  }
  0x8f   :  { %76 = vst.msk [vmem:[#allocation0] sm:$0x1] %vm75_vm12, %v74_v21  }
  0x94   :  { %v80_v29 = vpop.permute.xlu0 %79   ;;  %v86_v30 = vpop.permute.xlu1 %85  }
  0x95   :  { %82 = vst.msk [vmem:[#allocation0] sm:$0x1] %vm81_vm13, %v80_v29  }
  0x96   :  { %88 = vst.msk [vmem:[#allocation0] sm:$0x1] %vm87_vm14, %v86_v30  }
  0x97   :  { %94 = vst.msk [vmem:[#allocation0] sm:$0x1] %vm93_vm15, %v92_v24  }
  0x9e   :  { %v97_v31 = vld [vmem:[#allocation0] sm:$0x1] }
  0x9f   :  { %100 = vst [vmem:[%s208_s1] sm:$0x1] %v97_v31 }

// kernel: _conv_block_core.2
= control target key start
LH: loop header
LB: loop body
LE: loop exit
PB: predicated region body
PF: predicated region fallthrough
CT: control target
= control target key end

     0   :  { %vm50_vm0 = vcmask 261120   ;;  %vm161_vm1 = vcmask 523264   ;;  %s585_s0 = inlined_call_operand.vmem [shape: bf16[32,64], index: 0, kind: input, shape index: {}]   ;;  %s586_s1 = inlined_call_operand.vmem [shape: bf16[2,32,32], index: 1, kind: input, shape index: {}]   ;;  %s587_s2 = inlined_call_operand.vmem [shape: bf16[3,64,128], index: 2, kind: input, shape index: {}]   ;;  %s588_s3 = inlined_call_operand.vmem [shape: f32[1,128], index: 3, kind: input, shape index: {}]   ;;  %s589_s4 = inlined_call_operand.vmem [shape: bf16[32,128], index: 4, kind: output, shape index: {0}]   ;;  %s590_s5 = inlined_call_operand.vmem [shape: f32[1,2,128], index: 5, kind: output, shape index: {1}]  }
   0x1   :  { %v449_v0 = vld [vmem:[%s585_s0 + $0x8] sm:$0xff]  ;;  %v448_v1 = vld [vmem:[%s585_s0] sm:$0xff]  ;;  %v461_v4 = vld [vmem:[%s587_s2 + $0x38] sm:$0xff] }
   0x2   :  { %63 = vmatpush.bf16.msra.mxu0 %v449_v0  ;;  %477 = vmatpush.bf16.msra.mxu1 %v449_v0  ;;  %v450_v2 = vld [vmem:[%s586_s1] sm:$0xff]  ;;  %v451_v3 = vld [vmem:[%s586_s1 + $0x8] sm:$0xff]  ;;  %v457_v5 = vld [vmem:[%s587_s2 + $0x18] sm:$0xff] }
   0x3   :  { %172 = vmatpush.bf16.msra.mxu2 %v461_v4  ;;  %221 = vmatpush.bf16.msra.mxu3 %v457_v5  ;;  %v452_v6 = vld [vmem:[%s586_s1 + $0x10] sm:$0xff]  ;;  %v453_v7 = vld [vmem:[%s586_s1 + $0x18] sm:$0xff]  ;;  %v459_v10 = vld [vmem:[%s587_s2 + $0x28] sm:$0xff] }
   0x4   :  { %v460_v8 = vld [vmem:[%s587_s2 + $0x30] sm:$0xff]  ;;  %v455_v11 = vld [vmem:[%s587_s2 + $0x8] sm:$0xff]  ;;  %v458_v12 = vld [vmem:[%s587_s2 + $0x20] sm:$0xff] }
   0x5   :  { %v456_v9 = vld [vmem:[%s587_s2 + $0x10] sm:$0xff]  ;;  %v454_v13 = vld [vmem:[%s587_s2] sm:$0xff]  ;;  %v465_v14 = vld [vmem:[%s587_s2 + $0x58] sm:$0xff] }
   0x6   :  { %64 = vmatpush.bf16.msra.mxu0 %v448_v1  ;;  %478 = vmatpush.bf16.msra.mxu1 %v448_v1  ;;  %v464_v15 = vld [vmem:[%s587_s2 + $0x50] sm:$0xff]  ;;  %v463_v16 = vld [vmem:[%s587_s2 + $0x48] sm:$0xff]  ;;  %v462_v17 = vld [vmem:[%s587_s2 + $0x40] sm:$0xff] }
   0x7   :  { %173 = vmatpush.bf16.msra.mxu2 %v460_v8  ;;  %222 = vmatpush.bf16.msra.mxu3 %v456_v9  ;;  %v479_v38 = vld [vmem:[%s588_s3] ss:$0 sm:$0xff] }
   0x9   :  { %362 = vmatmul.msk.bf16.vlgmr.msra.gmra.mxu0 %vm50_vm0, %v450_v2  ;;  %363 = vmatmul.msk.bf16.vlgmr.msra.gmra.mxu1 %vm50_vm0, %v451_v3 }
   0xa   :  { %105 = vmatpush.bf16.msrb.mxu1 %v449_v0  ;;  %279 = vmatpush.bf16.msrb.mxu0 %v465_v14 }
   0xb   :  { %174 = vmatpush.bf16.msra.mxu2 %v459_v10  ;;  %223 = vmatpush.bf16.msra.mxu3 %v455_v11 }
   0xe   :  { %106 = vmatpush.bf16.msrb.mxu1 %v448_v1  ;;  %280 = vmatpush.bf16.msrb.mxu0 %v464_v15 }
   0xf   :  { %175 = vmatpush.bf16.msra.mxu2 %v458_v12  ;;  %224 = vmatpush.bf16.msra.mxu3 %v454_v13 }
  0x12   :  { %402 = vmatmul.msk.bf16.vlgmr.msra.gmra.mxu2 %vm161_vm1, %v448_v1  ;;  %281 = vmatpush.bf16.msrb.mxu0 %v463_v16 }
  0x16   :  { %282 = vmatpush.bf16.msrb.mxu0 %v462_v17 }
  0x19   :  { %376 = vmatmul.msk.bf16.vlgmr.msrb.gmra.mxu1 %vm50_vm0, %v452_v6 }
  0x22   :  { %403 = vmatmul.msk.bf16.gmra.mxu2 %vm161_vm1, %v449_v0 }
  0x29   :  { %377 = vmatmul.msk.bf16.gmra.mxu1 %vm50_vm0, %v453_v7 }
  0x86   :  { %v66_v18 = vpop.f32.mrf.mxu0  ;;  %v71_v19 = vpop.f32.mrf.mxu1 }
  0x8e   :  { %v68_v20 = vpop.f32.mrf.mxu0  ;;  %v73_v21 = vpop.f32.mrf.mxu1 }
  0x8f   :  { %v76_v22 = vpack.c.bf16 %v68_v20, %v66_v18  ;;  %v77_v25 = vpack.c.bf16 %v73_v21, %v71_v19 }
  0x91   :  { %420 = vmatmul.msk.bf16.vlgmr.msra.gmra.mxu3 %vm161_vm1, %v76_v22 }
  0x95   :  { %v177_v30 = vpop.f32.mrf.mxu2 }
  0x96   :  { %v108_v23 = vpop.f32.mrf.mxu1 }
  0x9d   :  { %v179_v32 = vpop.f32.mrf.mxu2 }
  0x9e   :  { %v110_v24 = vpop.f32.mrf.mxu1 }
  0x9f   :  { %v118_v26 = vpack.c.bf16 %v110_v24, %v108_v23 }
  0xa1   :  { %421 = vmatmul.msk.bf16.gmra.mxu3 %vm161_vm1, %v77_v25  ;;  %446 = vmatmul.msk.bf16.vlgmr.msrb.gmra.mxu0 %vm161_vm1, %v118_v26 }
  0xa5   :  { %v182_v41 = vpop.f32.mrf.mxu2 }
  0xa6   :  { %v113_v27 = vpop.f32.mrf.mxu1 }
  0xad   :  { %v184_v49 = vpop.f32.mrf.mxu2 }
  0xae   :  { %v115_v28 = vpop.f32.mrf.mxu1 }
  0xaf   :  { %v119_v29 = vpack.c.bf16 %v115_v28, %v113_v27 }
  0xb1   :  { %447 = vmatmul.msk.bf16.gmra.mxu0 %vm161_vm1, %v119_v29 }
 0x114   :  { %v226_v31 = vpop.f32.mrf.mxu3 }
 0x115   :  { %v227_v35 = vadd.f32 %v226_v31, %v177_v30 }
 0x11c   :  { %v228_v33 = vpop.f32.mrf.mxu3 }
 0x11d   :  { %v229_v36 = vadd.f32 %v228_v33, %v179_v32 }
 0x11e   :  { %v284_v34 = vpop.f32.mrf.mxu0 }
 0x11f   :  { %v294_v37 = vadd.f32 %v284_v34, %v227_v35 }
 0x121   :  { %v302_v43 = vadd.f32 %v479_v38, %v294_v37 }
 0x123   :  { %v324_v55 = vmul.f32 %v302_v43, %v302_v43 }
 0x124   :  { %v231_v42 = vpop.f32.mrf.mxu3 }
 0x125   :  { %v232_v46 = vadd.f32 %v231_v42, %v182_v41 }
 0x126   :  { %v286_v39 = vpop.f32.mrf.mxu0 }
 0x127   :  { %v295_v40 = vadd.f32 %v286_v39, %v229_v36 }
 0x129   :  { %v303_v44 = vadd.f32 %v479_v38, %v295_v40 }
 0x12b   :  { %v469_v45 = vpack.c.bf16 %v303_v44, %v302_v43  ;;  %v325_v52 = vmul.f32 %v303_v44, %v303_v44  ;;  %v314_v56 = vadd.f32 %v303_v44, %v302_v43 }
 0x12c   :  { %v233_v50 = vpop.f32.mrf.mxu3 }
 0x12d   :  { %470 = vst [vmem:[%s589_s4] sm:$0xff] %v469_v45   ;;  %v234_v53 = vadd.f32 %v233_v50, %v184_v49  ;;  %v328_v59 = vadd.f32 %v325_v52, %v324_v55 }
 0x12e   :  { %v289_v47 = vpop.f32.mrf.mxu0 }
 0x12f   :  { %v296_v48 = vadd.f32 %v289_v47, %v232_v46 }
 0x131   :  { %v304_v51 = vadd.f32 %v479_v38, %v296_v48 }
 0x133   :  { %v326_v57 = vmul.f32 %v304_v51, %v304_v51  ;;  %v315_v60 = vadd.f32 %v314_v56, %v304_v51 }
 0x135   :  { %v329_v62 = vadd.f32 %v328_v59, %v326_v57 }
 0x136   :  { %v291_v54 = vpop.f32.mrf.mxu0 }
 0x137   :  { %v297_v58 = vadd.f32 %v291_v54, %v234_v53 }
 0x139   :  { %v305_v61 = vadd.f32 %v479_v38, %v297_v58 }
 0x13b   :  { %v474_v63 = vpack.c.bf16 %v305_v61, %v304_v51  ;;  %v316_v0 = vadd.f32 %v315_v60, %v305_v61  ;;  %v327_v1 = vmul.f32 %v305_v61, %v305_v61 }
 0x13d   :  { %476 = vst [vmem:[%s589_s4 + $0x8] sm:$0xff] %v474_v63   ;;  %v317_v2 = vrot.slane %v316_v0, 4  ;;  %v330_v3 = vadd.f32 %v329_v62, %v327_v1 }
 0x13f   :  { %v318_v4 = vadd.f32 %v317_v2, %v316_v0  ;;  %v331_v5 = vrot.slane %v330_v3, 4 }
 0x141   :  { %v319_v6 = vrot.slane %v318_v4, 2  ;;  %v332_v7 = vadd.f32 %v331_v5, %v330_v3 }
 0x143   :  { %v320_v8 = vadd.f32 %v319_v6, %v318_v4  ;;  %v333_v9 = vrot.slane %v332_v7, 2 }
 0x145   :  { %v321_v10 = vrot.slane %v320_v8, 1  ;;  %v334_v11 = vadd.f32 %v333_v9, %v332_v7 }
 0x147   :  { %v322_v12 = vadd.f32 %v321_v10, %v320_v8  ;;  %v335_v13 = vrot.slane %v334_v11, 1 }
 0x149   :  { %323 = vst [vmem:[%s590_s5] sm:$0x1] %v322_v12  ;;  %v336_v14 = vadd.f32 %v335_v13, %v334_v11 }
 0x14b   :  { %337 = vst [vmem:[%s590_s5 + $0x1] sm:$0x1] %v336_v14 }

// kernel: _conv_block_core.3
= control target key start
LH: loop header
LB: loop body
LE: loop exit
PB: predicated region body
PF: predicated region fallthrough
CT: control target
= control target key end

     0   :  { %vm78_vm4 = vcmask 261120   ;;  %s813_s0 = inlined_call_operand.vmem [shape: bf16[32,128], index: 0, kind: input, shape index: {}]   ;;  %s814_s4 = inlined_call_operand.vmem [shape: f32[1,128], index: 4, kind: input, shape index: {}]   ;;  %s815_s5 = inlined_call_operand.vmem [shape: f32[1,128], index: 5, kind: input, shape index: {}]   ;;  %s816_s2 = inlined_call_operand.vmem [shape: bf16[3,128,128], index: 2, kind: input, shape index: {}]   ;;  %s817_s1 = inlined_call_operand.vmem [shape: bf16[2,32,32], index: 1, kind: input, shape index: {}]   ;;  %s818_s3 = inlined_call_operand.vmem [shape: f32[1,128], index: 3, kind: input, shape index: {}]   ;;  %s819_s6 = inlined_call_operand.vmem [shape: f32[32,128], index: 6, kind: output, shape index: {0}]   ;;  %s820_s7 = inlined_call_operand.vmem [shape: f32[1,2,128], index: 7, kind: output, shape index: {1}]  }
   0x1   :  { %v635_v0 = vld [vmem:[%s813_s0 + $0x8] sm:$0xff]   ;;  %v644_v1 = vld [vmem:[%s814_s4] ss:$0 sm:$0xff]  ;;  %v618_v10 = vld [vmem:[%s816_s2 + $0x78] sm:$0xff] }
   0x2   :  { %v633_v2 = vunpack.c.l.bf16 %v635_v0  ;;  %v634_v3 = vunpack.c.h.bf16 %v635_v0  ;;  %v645_v4 = vld [vmem:[%s815_s5] ss:$0 sm:$0xff]  ;;  %v610_v13 = vld [vmem:[%s816_s2 + $0x38] sm:$0xff]  ;;  %229 = vmatpush.bf16.msra.mxu2 %v618_v10  ;;  %v617_v16 = vld [vmem:[%s816_s2 + $0x70] sm:$0xff] }
   0x3   :  { %v628_v5 = vld [vmem:[%s813_s0] sm:$0xff]   ;;  %296 = vmatpush.bf16.msra.mxu3 %v610_v13  ;;  %v609_v19 = vld [vmem:[%s816_s2 + $0x30] sm:$0xff]  ;;  %v616_v26 = vld [vmem:[%s816_s2 + $0x68] sm:$0xff] }
   0x4   :  { %v629_v6 = vunpack.c.l.bf16 %v628_v5  ;;  %v630_v7 = vunpack.c.h.bf16 %v628_v5  ;;  %v40_v8 = vmul.f32 %v644_v1, %v633_v2  ;;  %v41_v9 = vmul.f32 %v644_v1, %v634_v3  ;;  %v608_v30 = vld [vmem:[%s816_s2 + $0x28] sm:$0xff]  ;;  %v626_v32 = vld [vmem:[%s816_s2 + $0xb8] sm:$0xff]  ;;  %v615_v33 = vld [vmem:[%s816_s2 + $0x60] sm:$0xff] }
   0x5   :  { %v607_v34 = vld [vmem:[%s816_s2 + $0x20] sm:$0xff]  ;;  %v601_v36 = vld [vmem:[%s817_s1 + $0x10] sm:$0xff]  ;;  %v614_v38 = vld [vmem:[%s816_s2 + $0x58] sm:$0xff] }
   0x6   :  { %v38_v11 = vmul.f32 %v644_v1, %v629_v6  ;;  %v39_v12 = vmul.f32 %v644_v1, %v630_v7  ;;  %v48_v14 = vadd.f32 %v645_v4, %v40_v8  ;;  %v49_v15 = vadd.f32 %v645_v4, %v41_v9  ;;  %230 = vmatpush.bf16.msra.mxu2 %v617_v16  ;;  %v599_v35 = vld [vmem:[%s817_s1] sm:$0xff]  ;;  %v625_v37 = vld [vmem:[%s816_s2 + $0xb0] sm:$0xff]  ;;  %v606_v39 = vld [vmem:[%s816_s2 + $0x18] sm:$0xff] }
   0x7   :  { %297 = vmatpush.bf16.msra.mxu3 %v609_v19  ;;  %v624_v40 = vld [vmem:[%s816_s2 + $0xa8] sm:$0xff]  ;;  %v613_v41 = vld [vmem:[%s816_s2 + $0x50] sm:$0xff]  ;;  %v623_v42 = vld [vmem:[%s816_s2 + $0xa0] sm:$0xff] }
   0x8   :  { %v46_v17 = vadd.f32 %v645_v4, %v38_v11  ;;  %v47_v18 = vadd.f32 %v645_v4, %v39_v12  ;;  %vm52_vm0 = vcmp.ge.f32.partialorder %v48_v14, 0.0  ;;  %vm53_vm1 = vcmp.ge.f32.partialorder %v49_v15, 0.0  ;;  %v612_v43 = vld [vmem:[%s816_s2 + $0x48] sm:$0xff]  ;;  %v622_v44 = vld [vmem:[%s816_s2 + $0x98] sm:$0xff]  ;;  %v611_v47 = vld [vmem:[%s816_s2 + $0x40] sm:$0xff] }
   0x9   :  { %v56_v20 = vmul.f32 0.01, %v48_v14  ;;  %v57_v21 = vmul.f32 0.01, %v49_v15  ;;  %v600_v45 = vld [vmem:[%s817_s1 + $0x8] sm:$0xff]  ;;  %v602_v46 = vld [vmem:[%s817_s1 + $0x18] sm:$0xff] }
   0xa   :  { %vm50_vm2 = vcmp.ge.f32.partialorder %v46_v17, 0.0  ;;  %vm51_vm3 = vcmp.ge.f32.partialorder %v47_v18, 0.0  ;;  %v54_v22 = vmul.f32 0.01, %v46_v17  ;;  %v55_v23 = vmul.f32 0.01, %v47_v18  ;;  %231 = vmatpush.bf16.msra.mxu2 %v616_v26 }
   0xb   :  { %v60_v24 = vsel %vm52_vm0, %v48_v14, %v56_v20  ;;  %v61_v25 = vsel %vm53_vm1, %v49_v15, %v57_v21  ;;  %298 = vmatpush.bf16.msra.mxu3 %v608_v30  ;;  %v605_v48 = vld [vmem:[%s816_s2 + $0x10] sm:$0xff]  ;;  %v604_v50 = vld [vmem:[%s816_s2 + $0x8] sm:$0xff]  ;;  %v603_v52 = vld [vmem:[%s816_s2] sm:$0xff] }
   0xc   :  { %v714_v27 = vpack.c.bf16 %v61_v25, %v60_v24  ;;  %v58_v28 = vsel %vm50_vm2, %v46_v17, %v54_v22  ;;  %v59_v29 = vsel %vm51_vm3, %v47_v18, %v55_v23  ;;  %v621_v49 = vld [vmem:[%s816_s2 + $0x90] sm:$0xff]  ;;  %v620_v51 = vld [vmem:[%s816_s2 + $0x88] sm:$0xff]  ;;  %v619_v53 = vld [vmem:[%s816_s2 + $0x80] sm:$0xff] }
   0xd   :  { %v62_v31 = vpack.c.bf16 %v59_v29, %v58_v28  ;;  %v646_v6 = vld [vmem:[%s818_s3] ss:$0 sm:$0xff] }
   0xe   :  { %91 = vmatpush.bf16.msra.mxu0 %v714_v27  ;;  %133 = vmatpush.bf16.msra.mxu1 %v714_v27 }
   0xf   :  { %232 = vmatpush.bf16.msra.mxu2 %v615_v33  ;;  %299 = vmatpush.bf16.msra.mxu3 %v607_v34 }
  0x12   :  { %92 = vmatpush.bf16.msra.mxu0 %v62_v31  ;;  %134 = vmatpush.bf16.msra.mxu1 %v62_v31 }
  0x13   :  { %233 = vmatpush.bf16.msra.mxu2 %v614_v38  ;;  %300 = vmatpush.bf16.msra.mxu3 %v606_v39 }
  0x15   :  { %455 = vmatmul.msk.bf16.vlgmr.msra.gmra.mxu0 %vm78_vm4, %v599_v35  ;;  %469 = vmatmul.msk.bf16.vlgmr.msra.gmra.mxu1 %vm78_vm4, %v601_v36 }
  0x16   :  { %380 = vmatpush.bf16.msrb.mxu0 %v626_v32  ;;  %636 = vmatpush.bf16.msrb.mxu1 %v626_v32 }
  0x17   :  { %234 = vmatpush.bf16.msra.mxu2 %v613_v41  ;;  %301 = vmatpush.bf16.msra.mxu3 %v605_v48 }
  0x1a   :  { %381 = vmatpush.bf16.msrb.mxu0 %v625_v37  ;;  %637 = vmatpush.bf16.msrb.mxu1 %v625_v37 }
  0x1b   :  { %235 = vmatpush.bf16.msra.mxu2 %v612_v43  ;;  %302 = vmatpush.bf16.msra.mxu3 %v604_v50 }
  0x1e   :  { %382 = vmatpush.bf16.msrb.mxu0 %v624_v40  ;;  %638 = vmatpush.bf16.msrb.mxu1 %v624_v40 }
  0x1f   :  { %236 = vmatpush.bf16.msra.mxu2 %v611_v47  ;;  %303 = vmatpush.bf16.msra.mxu3 %v603_v52 }
  0x22   :  { %383 = vmatpush.bf16.msrb.mxu0 %v623_v42  ;;  %639 = vmatpush.bf16.msrb.mxu1 %v623_v42 }
  0x23   :  { %237 = vmatmul.bf16.vlgmr.msra.gmra.mxu2 %v62_v31 }
  0x25   :  { %456 = vmatmul.msk.bf16.gmra.mxu0 %vm78_vm4, %v600_v45  ;;  %470 = vmatmul.msk.bf16.gmra.mxu1 %vm78_vm4, %v602_v46 }
  0x26   :  { %384 = vmatpush.bf16.msrb.mxu0 %v622_v44  ;;  %640 = vmatpush.bf16.msrb.mxu1 %v622_v44 }
  0x2a   :  { %385 = vmatpush.bf16.msrb.mxu0 %v621_v49  ;;  %641 = vmatpush.bf16.msrb.mxu1 %v621_v49 }
  0x2e   :  { %386 = vmatpush.bf16.msrb.mxu0 %v620_v51  ;;  %642 = vmatpush.bf16.msrb.mxu1 %v620_v51 }
  0x32   :  { %387 = vmatpush.bf16.msrb.mxu0 %v619_v53  ;;  %643 = vmatpush.bf16.msrb.mxu1 %v619_v53 }
  0x33   :  { %242 = vmatmul.bf16.gmra.mxu2 %v714_v27 }
  0x92   :  { %v94_v54 = vpop.f32.mrf.mxu0  ;;  %v136_v55 = vpop.f32.mrf.mxu1 }
  0x9a   :  { %v96_v56 = vpop.f32.mrf.mxu0  ;;  %v138_v57 = vpop.f32.mrf.mxu1 }
  0x9b   :  { %v104_v58 = vpack.c.bf16 %v96_v56, %v94_v54  ;;  %v146_v59 = vpack.c.bf16 %v138_v57, %v136_v55 }
  0x9d   :  { %304 = vmatmul.bf16.vlgmr.msra.gmra.mxu3 %v104_v58  ;;  %388 = vmatmul.bf16.vlgmr.msrb.gmra.mxu0 %v146_v59 }
  0xa2   :  { %v99_v60 = vpop.f32.mrf.mxu0  ;;  %v141_v61 = vpop.f32.mrf.mxu1 }
  0xa6   :  { %v238_v2 = vpop.f32.mrf.mxu2 }
  0xaa   :  { %v101_v62 = vpop.f32.mrf.mxu0  ;;  %v143_v63 = vpop.f32.mrf.mxu1 }
  0xab   :  { %v105_v0 = vpack.c.bf16 %v101_v62, %v99_v60  ;;  %v147_v1 = vpack.c.bf16 %v143_v63, %v141_v61 }
  0xad   :  { %309 = vmatmul.bf16.gmra.mxu3 %v105_v0  ;;  %393 = vmatmul.bf16.vlgmr.msrb.gmra.mxu1 %v147_v1 }
  0xae   :  { %v240_v8 = vpop.f32.mrf.mxu2 }
  0xb6   :  { %v243_v15 = vpop.f32.mrf.mxu2 }
  0xbe   :  { %v245_v21 = vpop.f32.mrf.mxu2 }
 0x11a   :  { %v389_v3 = vpop.f32.mrf.mxu0 }
 0x120   :  { %v305_v4 = vpop.f32.mrf.mxu3 }
 0x121   :  { %v306_v5 = vadd.f32 %v305_v4, %v238_v2 }
 0x122   :  { %v391_v12 = vpop.f32.mrf.mxu0 }
 0x123   :  { %v399_v7 = vadd.f32 %v389_v3, %v306_v5 }
 0x125   :  { %v407_v9 = vadd.f32 %v646_v6, %v399_v7 }
 0x127   :  { %411 = vst [vmem:[%s819_s6] sm:$0xff] %v407_v9  ;;  %v425_v26 = vmul.f32 %v407_v9, %v407_v9 }
 0x128   :  { %v307_v10 = vpop.f32.mrf.mxu3 }
 0x129   :  { %v308_v11 = vadd.f32 %v307_v10, %v240_v8 }
 0x12a   :  { %v394_v16 = vpop.f32.mrf.mxu1 }
 0x12b   :  { %v400_v13 = vadd.f32 %v391_v12, %v308_v11 }
 0x12d   :  { %v408_v14 = vadd.f32 %v646_v6, %v400_v13 }
 0x12f   :  { %412 = vst [vmem:[%s819_s6 + $0x8] sm:$0xff] %v408_v14  ;;  %v426_v23 = vmul.f32 %v408_v14, %v408_v14  ;;  %v415_v27 = vadd.f32 %v408_v14, %v407_v9 }
 0x130   :  { %v310_v17 = vpop.f32.mrf.mxu3 }
 0x131   :  { %v311_v18 = vadd.f32 %v310_v17, %v243_v15  ;;  %v429_v30 = vadd.f32 %v426_v23, %v425_v26 }
 0x132   :  { %v396_v25 = vpop.f32.mrf.mxu1 }
 0x133   :  { %v401_v19 = vadd.f32 %v394_v16, %v311_v18 }
 0x135   :  { %v409_v20 = vadd.f32 %v646_v6, %v401_v19 }
 0x137   :  { %413 = vst [vmem:[%s819_s6 + $0x10] sm:$0xff] %v409_v20  ;;  %v427_v28 = vmul.f32 %v409_v20, %v409_v20  ;;  %v416_v31 = vadd.f32 %v415_v27, %v409_v20 }
 0x138   :  { %v312_v22 = vpop.f32.mrf.mxu3 }
 0x139   :  { %v313_v24 = vadd.f32 %v312_v22, %v245_v21  ;;  %v430_v33 = vadd.f32 %v429_v30, %v427_v28 }
 0x13b   :  { %v402_v29 = vadd.f32 %v396_v25, %v313_v24 }
 0x13d   :  { %v410_v32 = vadd.f32 %v646_v6, %v402_v29 }
 0x13f   :  { %414 = vst [vmem:[%s819_s6 + $0x18] sm:$0xff] %v410_v32  ;;  %v417_v34 = vadd.f32 %v416_v31, %v410_v32  ;;  %v428_v35 = vmul.f32 %v410_v32, %v410_v32 }
 0x141   :  { %v418_v36 = vrot.slane %v417_v34, 4  ;;  %v431_v37 = vadd.f32 %v430_v33, %v428_v35 }
 0x143   :  { %v419_v38 = vadd.f32 %v418_v36, %v417_v34  ;;  %v432_v39 = vrot.slane %v431_v37, 4 }
 0x145   :  { %v420_v40 = vrot.slane %v419_v38, 2  ;;  %v433_v41 = vadd.f32 %v432_v39, %v431_v37 }
 0x147   :  { %v421_v42 = vadd.f32 %v420_v40, %v419_v38  ;;  %v434_v43 = vrot.slane %v433_v41, 2 }
 0x149   :  { %v422_v44 = vrot.slane %v421_v42, 1  ;;  %v435_v45 = vadd.f32 %v434_v43, %v433_v41 }
 0x14b   :  { %v423_v46 = vadd.f32 %v422_v44, %v421_v42  ;;  %v436_v47 = vrot.slane %v435_v45, 1 }
 0x14d   :  { %424 = vst [vmem:[%s820_s7] sm:$0x1] %v423_v46  ;;  %v437_v48 = vadd.f32 %v436_v47, %v435_v45 }
 0x14f   :  { %438 = vst [vmem:[%s820_s7 + $0x1] sm:$0x1] %v437_v48 }

</bundles_post_ra>
